<compile_context>
chip_gen: v7x
topology: tpu7x:2x2x1
jax: 0.10.0
libtpu: 0.0.40
codegen_flags: <defaults>
</compile_context>

<pallas_src>
import functools

import jax
import jax.numpy as jnp
from jax import lax
from jax.experimental import pallas as pl
from jax.experimental.pallas import tpu as pltpu


def _round_up(x, m):
    return ((x + m - 1) // m) * m


def _pam_flash_kernel(q_ref, k_ref, v_ref, x_ref, gamma_ref, out_ref,
                      acc_scr, m_scr, l_scr, *,
                      tile_kv, tiles_per_block, n_true, need_mask,
                      last_block_only, last_tile_start, compute_dtype,
                      approx_recip):
    """One (batch, query-tile, kv-block) step of online-softmax attention.

    Ref shapes (leading block dims of size 1 dropped by indexing [0]):
      q_ref  : (1, C8P, TQ)         projected queries (compute dtype)
      k_ref  : (1, TPB, C8P, TKV)   projected keys, tile-major
      v_ref  : (1, TPB, C,  TKV)    projected values, tile-major
      x_ref  : (1, C, TQ)           residual input tile
      out_ref: (1, C, TQ)
    """
    si = pl.program_id(2)
    n_blocks = pl.num_programs(2)

    # ---- per-(batch, q-tile) init of the online-softmax state.
    @pl.when(si == 0)
    def _init():
        # Finite init (not -inf) so exp(m_prev - m_new) is always well defined;
        # masked logits use -inf so they can never receive weight exp(0)=1.
        m_scr[...] = jnp.full_like(m_scr, -1e30)
        l_scr[...] = jnp.zeros_like(l_scr)
        acc_scr[...] = jnp.zeros_like(acc_scr)

    q = q_ref[0]                                                    # (C8P, TQ)

    def _logits(k_t):
        # e[j, i] = sum_c k[c, j] * q[c, i] -> (TKV, TQ).  Contract the leading
        # (channel) dim of both operands; no explicit transpose materialized.
        return lax.dot_general(k_t, q, (((0,), (0,)), ((), ())),
                               preferred_element_type=jnp.float32)

    def _update(e, v_t):
        # One online-softmax accumulation step.
        # e: (TKV, TQ) f32 logits; v_t: (C, TKV) compute dtype.
        m_prev = m_scr[...]                                         # (1, TQ)
        m_new = jnp.maximum(m_prev, jnp.max(e, axis=0, keepdims=True))
        p = jnp.exp(e - m_new)                                      # (TKV,TQ) f32
        alpha = jnp.exp(m_prev - m_new)                             # (1, TQ)
        l_scr[...] = alpha * l_scr[...] + jnp.sum(p, axis=0, keepdims=True)
        acc_scr[...] = alpha * acc_scr[...] + jnp.dot(
            v_t, p.astype(compute_dtype),
            preferred_element_type=jnp.float32)                     # (C, TQ)
        m_scr[...] = m_new

    # ---- all KV tiles of this block except the last one: never masked.
    if tiles_per_block > 1:
        def _kv_step(t, carry):
            _update(_logits(k_ref[0, t]), v_ref[0, t])
            return carry
        lax.fori_loop(0, tiles_per_block - 1, _kv_step, 0)

    # ---- last KV tile of this block: mask padded keys iff this is the global
    #      last tile and N was padded up to the tile size.
    last = tiles_per_block - 1
    e_last = _logits(k_ref[0, last])
    v_last = v_ref[0, last]

    if need_mask:
        def _masked_update():
            j = last_tile_start + lax.broadcasted_iota(jnp.int32, (tile_kv, 1), 0)
            _update(jnp.where(j < n_true, e_last, jnp.float32(-jnp.inf)), v_last)

        if last_block_only:              # single KV block: always global last
            _masked_update()
        else:
            @pl.when(si == n_blocks - 1)
            def _():
                _masked_update()

            @pl.when(si != n_blocks - 1)
            def _():
                _update(e_last, v_last)
    else:
        _update(e_last, v_last)

    # ---- finalize: normalize, gamma-scale, residual add (lane-dense store).
    @pl.when(si == n_blocks - 1)
    def _finalize():
        inv_l = pl.reciprocal(l_scr[...], approx=approx_recip)      # (1, TQ)
        out = gamma_ref[0] * (acc_scr[...] * inv_l) + x_ref[0].astype(jnp.float32)
        out_ref[0] = out.astype(out_ref.dtype)


def pam_module(x_nchw, wq, bq, wk, bk, wv, bv, gamma, *,
               tile_q=None, tile_kv=None, compute_dtype=jnp.bfloat16,
               kv_resident_bytes=8 * 1024 * 1024, vmem_limit_bytes=None):
    """PAM forward.  x_nchw: (B, C, H, W).  Weights follow PyTorch Conv2d k=1
    shapes: wq/wk: (C//8, C, 1, 1), wv: (C, C, 1, 1); biases 1-D; gamma: (1,).

    compute_dtype sets the MXU operand dtype for the energy / PV matmuls
    (accumulation and softmax statistics are always f32).  bf16 gives full MXU
    rate; pass jnp.float32 for tighter agreement with the f32 reference.
    """
    B, C, H, W = x_nchw.shape
    N = H * W
    C8 = wq.shape[0]
    cdt = jnp.dtype(compute_dtype)
    itm = cdt.itemsize

    # ---- tile selection -----------------------------------------------------
    if tile_q is None:
        tile_q = 128 if N <= 128 else 256
    n_pad = _round_up(N, tile_q)
    if tile_kv is None:
        # Larger KV tiles -> fewer online-softmax rescale steps; must divide
        # the padded sequence length.
        tile_kv = next(t for t in (512, 256, 128) if n_pad % t == 0)
    if n_pad % tile_kv:
        raise ValueError("tile_kv must divide the padded sequence length")
    if n_pad != N and tile_kv < tile_q:
        # Padded keys must all land in the last KV tile (the mask is only
        # applied there); n_pad - N < tile_q <= tile_kv guarantees that.
        raise ValueError("tile_kv must be >= tile_q when N is not tile-aligned")

    n_q_tiles = n_pad // tile_q
    n_kv_tiles = n_pad // tile_kv

    # Projected-channel dim sits in the sublane position everywhere it is
    # used, so padding to the sublane multiple (16) is enough -- not 128.
    c8p = _round_up(C8, 16)

    # Keep the whole per-batch K/V resident in VMEM when it fits the budget
    # (the KV grid axis collapses to one block, so K/V are DMA'd once per
    # batch); otherwise stream one KV tile per grid step.
    kv_bytes = n_pad * (c8p + C) * itm
    tiles_per_block = n_kv_tiles if kv_bytes <= kv_resident_bytes else 1
    n_kv_blocks = n_kv_tiles // tiles_per_block
    kv_block = tiles_per_block * tile_kv

    # ---- hoisted 1x1-conv projections (plain XLA matmuls, done once) --------
    # (B, C, H, W) -> (B, C, N): free reshape, no HBM transpose.
    x_bcn = x_nchw.reshape(B, C, N)
    if n_pad != N:
        # Single pad of x; Q/K/V inherit it.  Padded keys are masked in-kernel,
        # padded query columns are sliced off afterwards.
        x_bcn = jnp.pad(x_bcn, ((0, 0), (0, 0), (0, n_pad - N)))

    wq_m = jnp.pad(wq.reshape(C8, C), ((0, c8p - C8), (0, 0))).astype(cdt)
    wk_m = jnp.pad(wk.reshape(C8, C), ((0, c8p - C8), (0, 0))).astype(cdt)
    wv_m = wv.reshape(C, C).astype(cdt)
    bq_p = jnp.pad(bq.astype(jnp.float32), (0, c8p - C8))
    bk_p = jnp.pad(bk.astype(jnp.float32), (0, c8p - C8))
    bv_p = bv.astype(jnp.float32)

    xc = x_bcn.astype(cdt)                                   # (B, C, Np)
    x4 = xc.reshape(B, C, n_kv_tiles, tile_kv)               # tile-split (free)

    # Q stays position-major (B, c8p, Np); the query tile is selected by the
    # BlockSpec.  K/V are produced tile-major (B, T, c8p|C, tile_kv) so the
    # kernel selects KV tiles by a leading-dim index (layout-friendly).
    q_all = (jnp.einsum("oc,bcn->bon", wq_m, xc,
                        preferred_element_type=jnp.float32)
             + bq_p[None, :, None]).astype(cdt)              # (B, c8p, Np)
    k_all = (jnp.einsum("oc,bctn->bton", wk_m, x4,
                        preferred_element_type=jnp.float32)
             + bk_p[None, None, :, None]).astype(cdt)        # (B, T, c8p, tkv)
    v_all = (jnp.einsum("oc,bctn->bton", wv_m, x4,
                        preferred_element_type=jnp.float32)
             + bv_p[None, None, :, None]).astype(cdt)        # (B, T, C, tkv)
    gamma_s = gamma.reshape(1).astype(jnp.float32)

    # ---- VMEM budget derived from actual block sizes (+ headroom) -----------
    if vmem_limit_bytes is None:
        per_buf = (c8p * tile_q * itm                        # Q block
                   + (c8p + C) * kv_block * itm              # K + V block
                   + C * tile_q * x_bcn.dtype.itemsize       # residual block
                   + C * tile_q * x_nchw.dtype.itemsize)     # output block
        scratch = (C + 2) * tile_q * 4
        vmem_limit_bytes = 2 * per_buf + scratch + (8 << 20)  # dbl-buffered

    kernel = functools.partial(
        _pam_flash_kernel,
        tile_kv=tile_kv, tiles_per_block=tiles_per_block,
        n_true=N, need_mask=(n_pad != N),
        last_block_only=(n_kv_blocks == 1),
        last_tile_start=n_pad - tile_kv,
        compute_dtype=cdt,
        approx_recip=(cdt != jnp.dtype(jnp.float32)))

    out_pad = pl.pallas_call(
        kernel,
        out_shape=jax.ShapeDtypeStruct((B, C, n_pad), x_nchw.dtype),
        grid_spec=pltpu.PrefetchScalarGridSpec(
            num_scalar_prefetch=0,
            grid=(B, n_q_tiles, n_kv_blocks),
            in_specs=[
                pl.BlockSpec((1, c8p, tile_q),
                             lambda b, qi, si: (b, 0, qi)),            # Q
                pl.BlockSpec((1, tiles_per_block, c8p, tile_kv),
                             lambda b, qi, si: (b, si, 0, 0)),          # K
                pl.BlockSpec((1, tiles_per_block, C, tile_kv),
                             lambda b, qi, si: (b, si, 0, 0)),          # V
                pl.BlockSpec((1, C, tile_q),
                             lambda b, qi, si: (b, 0, qi)),             # x (residual)
                pl.BlockSpec(memory_space=pltpu.MemorySpace.SMEM),      # gamma
            ],
            out_specs=pl.BlockSpec((1, C, tile_q),
                                   lambda b, qi, si: (b, 0, qi)),
            scratch_shapes=[
                pltpu.VMEM((C, tile_q), jnp.float32),   # output accumulator
                pltpu.VMEM((1, tile_q), jnp.float32),   # running max
                pltpu.VMEM((1, tile_q), jnp.float32),   # running sum
            ],
        ),
        compiler_params=pltpu.CompilerParams(
            dimension_semantics=("parallel", "parallel", "arbitrary"),
            vmem_limit_bytes=int(vmem_limit_bytes),
        ),
    )(q_all, k_all, v_all, x_bcn, gamma_s)

    if n_pad != N:
        out_pad = out_pad[:, :, :N]
    return out_pad.reshape(B, C, H, W)


def pam_reference(x, wq, bq, wk, bk, wv, bv, gamma):
    """Pure-JAX f32 reference mirroring the PyTorch forward exactly."""
    B, C, H, W = x.shape
    N = H * W
    C8 = wq.shape[0]

    def conv1x1(x, w, b):   # w: (Cout, Cin, 1, 1)
        return jnp.einsum("bchw,oc->bohw", x, w.reshape(w.shape[0], C)) \
            + b[None, :, None, None]

    q = conv1x1(x, wq, bq).reshape(B, C8, N).transpose(0, 2, 1)   # (B, N, C8)
    k = conv1x1(x, wk, bk).reshape(B, C8, N)                      # (B, C8, N)
    energy = jnp.einsum("bnc,bcm->bnm", q, k)                     # (B, N, N)
    attn = jax.nn.softmax(energy, axis=-1)
    v = conv1x1(x, wv, bv).reshape(B, C, N)                       # (B, C, N)
    out = jnp.einsum("bcn,bmn->bcm", v, attn)                     # (B, C, N)
    return gamma.reshape(()) * out.reshape(B, C, H, W) + x


if __name__ == "__main__":
    key = jax.random.PRNGKey(0)
    k_x1, k_x2, k_x3, k_wq, k_bq, k_wk, k_bk, k_wv, k_bv = jax.random.split(key, 9)

    B, C = 2, 32
    C8 = C // 8
    wq = jax.random.normal(k_wq, (C8, C, 1, 1), jnp.float32) * 0.1
    bq = jax.random.normal(k_bq, (C8,), jnp.float32) * 0.1
    wk = jax.random.normal(k_wk, (C8, C, 1, 1), jnp.float32) * 0.1
    bk = jax.random.normal(k_bk, (C8,), jnp.float32) * 0.1
    wv = jax.random.normal(k_wv, (C, C, 1, 1), jnp.float32) * 0.1
    bv = jax.random.normal(k_bv, (C,), jnp.float32) * 0.1
    # PyTorch inits gamma to zeros(1); use a nonzero value so the attention
    # path contributes to the checked output.
    gamma = jnp.array([0.5], dtype=jnp.float32)

    # --- Test 1: N=64 (padded to one 128-wide tile, masked tail), bf16 MXU,
    # whole K/V resident (single KV block, static mask path).
    x1 = jax.random.normal(k_x1, (B, C, 8, 8), jnp.float32)
    out1 = jax.block_until_ready(pam_module(x1, wq, bq, wk, bk, wv, bv, gamma))
    ref1 = pam_reference(x1, wq, bq, wk, bk, wv, bv, gamma)
    assert out1.shape == x1.shape
    err1 = float(jnp.max(jnp.abs(out1 - ref1)))
    assert jnp.allclose(out1, ref1, atol=2e-2, rtol=2e-2), err1   # bf16 MXU tolerance

    # --- Test 2: N=256, 128-wide q/kv tiles, resident K/V -> 2 KV tiles in one
    # block: exercises the in-kernel fori_loop online softmax; f32 compute for
    # a tight check (exact reciprocal on this path).
    x2 = jax.random.normal(k_x2, (B, C, 16, 16), jnp.float32)
    out2 = jax.block_until_ready(
        pam_module(x2, wq, bq, wk, bk, wv, bv, gamma,
                   tile_q=128, tile_kv=128, compute_dtype=jnp.float32))
    ref2 = pam_reference(x2, wq, bq, wk, bk, wv, bv, gamma)
    err2 = float(jnp.max(jnp.abs(out2 - ref2)))
    assert jnp.allclose(out2, ref2, atol=1e-3, rtol=1e-3), err2

    # --- Test 3: N=200 (ragged tail) with kv_resident_bytes=0 to force the
    # streaming fallback: 2 KV blocks on the grid, mask applied only on the
    # last one (both pl.when mask branches exercised); f32 compute.
    x3 = jax.random.normal(k_x3, (B, C, 10, 20), jnp.float32)
    out3 = jax.block_until_ready(
        pam_module(x3, wq, bq, wk, bk, wv, bv, gamma,
                   tile_q=128, tile_kv=128, compute_dtype=jnp.float32,
                   kv_resident_bytes=0))
    ref3 = pam_reference(x3, wq, bq, wk, bk, wv, bv, gamma)
    err3 = float(jnp.max(jnp.abs(out3 - ref3)))
    assert jnp.allclose(out3, ref3, atol=1e-3, rtol=1e-3), err3

    print("KERNEL_OK")
</pallas_src>

<mosaic_0001>
module attributes {stable_mosaic.version = 11 : i64} {
  func.func @_pam_flash_kernel(%arg0: i32, %arg1: i32, %arg2: i32, %arg3: memref<1x16x128xbf16, #tpu.memory_space<vmem>>, %arg4: memref<1x1x16x128xbf16, #tpu.memory_space<vmem>>, %arg5: memref<1x1x32x128xbf16, #tpu.memory_space<vmem>>, %arg6: memref<1x32x128xf32, #tpu.memory_space<vmem>>, %arg7: memref<1xf32, #tpu.memory_space<smem>>, %arg8: memref<1x32x128xf32, #tpu.memory_space<vmem>>, %arg9: memref<32x128xf32, #tpu.memory_space<vmem>>, %arg10: memref<1x128xf32, #tpu.memory_space<vmem>>, %arg11: memref<1x128xf32, #tpu.memory_space<vmem>>) attributes {dimension_semantics = [#tpu.dimension_semantics<parallel>, #tpu.dimension_semantics<parallel>, #tpu.dimension_semantics<arbitrary>], iteration_bounds = array<i64: 2, 1, 1>, scalar_prefetch = 0 : i64, scratch_operands = 3 : i64, tpu.core_type = #tpu.core_type<tc>, window_params = [{transform_indices = @transform_0, window_bounds = array<i64: 1, 16, 128>}, {transform_indices = @transform_1, window_bounds = array<i64: 1, 1, 16, 128>}, {transform_indices = @transform_2, window_bounds = array<i64: 1, 1, 32, 128>}, {transform_indices = @transform_3, window_bounds = array<i64: 1, 32, 128>}, {transform_indices = @transform_4, window_bounds = array<i64: 1>}, {transform_indices = @transform_5, window_bounds = array<i64: 1, 32, 128>}]} {
    %c0_i32 = arith.constant 0 : i32
    %0 = arith.cmpi eq, %arg2, %c0_i32 : i32
    %1 = arith.extui %0 : i1 to i32
    %c0_i32_0 = arith.constant 0 : i32
    %2 = arith.cmpi ne, %1, %c0_i32_0 : i32
    scf.if %2 {
      %cst_30 = arith.constant -1.000000e+30 : f32
      %45 = vector.broadcast %cst_30 : f32 to vector<1x128xf32>
      %c0_31 = arith.constant 0 : index
      %c0_32 = arith.constant 0 : index
      %46 = vector.load %arg10[%c0_31, %c0_32] : memref<1x128xf32, #tpu.memory_space<vmem>>, vector<1x128xf32>
      tpu.vector_store %arg10[%c0_31, %c0_32], %45 {strides = array<i32>} : memref<1x128xf32, #tpu.memory_space<vmem>>, vector<1x128xf32>,
      %cst_33 = arith.constant 0.000000e+00 : f32
      %47 = vector.broadcast %cst_33 : f32 to vector<1x128xf32>
      %c0_34 = arith.constant 0 : index
      %c0_35 = arith.constant 0 : index
      %48 = vector.load %arg11[%c0_34, %c0_35] : memref<1x128xf32, #tpu.memory_space<vmem>>, vector<1x128xf32>
      tpu.vector_store %arg11[%c0_34, %c0_35], %47 {strides = array<i32>} : memref<1x128xf32, #tpu.memory_space<vmem>>, vector<1x128xf32>,
      %cst_36 = arith.constant 0.000000e+00 : f32
      %49 = vector.broadcast %cst_36 : f32 to vector<32x128xf32>
      %c0_37 = arith.constant 0 : index
      %c0_38 = arith.constant 0 : index
      %50 = vector.load %arg9[%c0_37, %c0_38] : memref<32x128xf32, #tpu.memory_space<vmem>>, vector<32x128xf32>
      tpu.vector_store %arg9[%c0_37, %c0_38], %49 {strides = array<i32>} : memref<32x128xf32, #tpu.memory_space<vmem>>, vector<32x128xf32>,
    } else {
    }
    %c0 = arith.constant 0 : index
    %c0_1 = arith.constant 0 : index
    %c0_2 = arith.constant 0 : index
    %3 = vector.load %arg3[%c0, %c0_1, %c0_2] : memref<1x16x128xbf16, #tpu.memory_space<vmem>>, vector<1x16x128xbf16>
    %4 = vector.shape_cast %3 : vector<1x16x128xbf16> to vector<16x128xbf16>
    %c0_3 = arith.constant 0 : index
    %c0_4 = arith.constant 0 : index
    %c0_5 = arith.constant 0 : index
    %c0_6 = arith.constant 0 : index
    %5 = vector.load %arg4[%c0_3, %c0_4, %c0_5, %c0_6] : memref<1x1x16x128xbf16, #tpu.memory_space<vmem>>, vector<1x1x16x128xbf16>
    %6 = vector.shape_cast %5 : vector<1x1x16x128xbf16> to vector<16x128xbf16>
    %cst = arith.constant dense<0.000000e+00> : vector<128x128xf32>
    %7 = tpu.matmul %6, %4, %cst {dimension_numbers = #tpu.dot_dimension_numbers<[0], [0], [1], [1], [0, 1, 1, 1], [], []>} : vector<16x128xbf16>, vector<16x128xbf16>, vector<128x128xf32> -> vector<128x128xf32>
    %c0_7 = arith.constant 0 : index
    %c0_8 = arith.constant 0 : index
    %c0_9 = arith.constant 0 : index
    %c0_10 = arith.constant 0 : index
    %8 = vector.load %arg5[%c0_7, %c0_8, %c0_9, %c0_10] : memref<1x1x32x128xbf16, #tpu.memory_space<vmem>>, vector<1x1x32x128xbf16>
    %9 = vector.shape_cast %8 : vector<1x1x32x128xbf16> to vector<32x128xbf16>
    %10 = tpu.iota {dimensions = array<i32: 0>} : vector<128x1xi32>
    %c0_i32_11 = arith.constant 0 : i32
    %11 = vector.broadcast %c0_i32_11 : i32 to vector<128x1xi32>
    %12 = arith.addi %11, %10 : vector<128x1xi32>
    %c64_i32 = arith.constant 64 : i32
    %13 = vector.broadcast %c64_i32 : i32 to vector<128x1xi32>
    %14 = arith.cmpi slt, %12, %13 : vector<128x1xi32>
    %cst_12 = arith.constant 0xFF800000 : f32
    %15 = vector.shape_cast %14 : vector<128x1xi1> to vector<128x1xi1>
    %16 = vector.broadcast %15 : vector<128x1xi1> to vector<128x128xi1>
    %17 = vector.broadcast %cst_12 : f32 to vector<128x128xf32>
    %18 = arith.select %16, %7, %17 : vector<128x128xi1>, vector<128x128xf32>
    %c0_13 = arith.constant 0 : index
    %c0_14 = arith.constant 0 : index
    %19 = vector.load %arg10[%c0_13, %c0_14] : memref<1x128xf32, #tpu.memory_space<vmem>>, vector<1x128xf32>
    %cst_15 = arith.constant dense<0xFF800000> : vector<128xf32>
    %20 = vector.multi_reduction <maximumf>, %18, %cst_15 [0] : vector<128x128xf32> to vector<128xf32>
    %21 = vector.shape_cast %20 : vector<128xf32> to vector<1x128xf32>
    %22 = arith.maximumf %19, %21 : vector<1x128xf32>
    %23 = vector.broadcast %22 : vector<1x128xf32> to vector<128x128xf32>
    %24 = arith.subf %18, %23 : vector<128x128xf32>
    %25 = math.exp %24 : vector<128x128xf32>
    %26 = arith.subf %19, %22 : vector<1x128xf32>
    %27 = math.exp %26 : vector<1x128xf32>
    %c0_16 = arith.constant 0 : index
    %c0_17 = arith.constant 0 : index
    %28 = vector.load %arg11[%c0_16, %c0_17] : memref<1x128xf32, #tpu.memory_space<vmem>>, vector<1x128xf32>
    %29 = arith.mulf %27, %28 : vector<1x128xf32>
    %cst_18 = arith.constant dense<0.000000e+00> : vector<128xf32>
    %30 = vector.multi_reduction <add>, %25, %cst_18 [0] : vector<128x128xf32> to vector<128xf32>
    %31 = vector.shape_cast %30 : vector<128xf32> to vector<1x128xf32>
    %32 = arith.addf %29, %31 : vector<1x128xf32>
    %c0_19 = arith.constant 0 : index
    %c0_20 = arith.constant 0 : index
    %33 = vector.load %arg11[%c0_19, %c0_20] : memref<1x128xf32, #tpu.memory_space<vmem>>, vector<1x128xf32>
    tpu.vector_store %arg11[%c0_19, %c0_20], %32 {strides = array<i32>} : memref<1x128xf32, #tpu.memory_space<vmem>>, vector<1x128xf32>,
    %c0_21 = arith.constant 0 : index
    %c0_22 = arith.constant 0 : index
    %34 = vector.load %arg9[%c0_21, %c0_22] : memref<32x128xf32, #tpu.memory_space<vmem>>, vector<32x128xf32>
    %35 = vector.broadcast %27 : vector<1x128xf32> to vector<32x128xf32>
    %36 = arith.mulf %35, %34 : vector<32x128xf32>
    %37 = arith.truncf %25 : vector<128x128xf32> to vector<128x128xbf16>
    %cst_23 = arith.constant dense<0.000000e+00> : vector<32x128xf32>
    %38 = tpu.matmul %9, %37, %cst_23 {dimension_numbers = #tpu.dot_dimension_numbers<[1], [0], [0], [1], [0, 0, 1, 1], [], []>} : vector<32x128xbf16>, vector<128x128xbf16>, vector<32x128xf32> -> vector<32x128xf32>
    %39 = arith.addf %36, %38 : vector<32x128xf32>
    %c0_24 = arith.constant 0 : index
    %c0_25 = arith.constant 0 : index
    %40 = vector.load %arg9[%c0_24, %c0_25] : memref<32x128xf32, #tpu.memory_space<vmem>>, vector<32x128xf32>
    tpu.vector_store %arg9[%c0_24, %c0_25], %39 {strides = array<i32>} : memref<32x128xf32, #tpu.memory_space<vmem>>, vector<32x128xf32>,
    %c0_26 = arith.constant 0 : index
    %c0_27 = arith.constant 0 : index
    %41 = vector.load %arg10[%c0_26, %c0_27] : memref<1x128xf32, #tpu.memory_space<vmem>>, vector<1x128xf32>
    tpu.vector_store %arg10[%c0_26, %c0_27], %22 {strides = array<i32>} : memref<1x128xf32, #tpu.memory_space<vmem>>, vector<1x128xf32>,
    %c0_i32_28 = arith.constant 0 : i32
    %42 = arith.cmpi eq, %arg2, %c0_i32_28 : i32
    %43 = arith.extui %42 : i1 to i32
    %c0_i32_29 = arith.constant 0 : i32
    %44 = arith.cmpi ne, %43, %c0_i32_29 : i32
    scf.if %44 {
      %c0_30 = arith.constant 0 : index
      %c0_31 = arith.constant 0 : index
      %45 = vector.load %arg11[%c0_30, %c0_31] : memref<1x128xf32, #tpu.memory_space<vmem>>, vector<1x128xf32>
      %46 = tpu.reciprocal %45 {approx = true} : vector<1x128xf32> -> vector<1x128xf32>
      %c0_32 = arith.constant 0 : index
      %47 = memref.load %arg7[%c0_32] : memref<1xf32, #tpu.memory_space<smem>>
      %c0_33 = arith.constant 0 : index
      %c0_34 = arith.constant 0 : index
      %48 = vector.load %arg9[%c0_33, %c0_34] : memref<32x128xf32, #tpu.memory_space<vmem>>, vector<32x128xf32>
      %49 = vector.broadcast %46 : vector<1x128xf32> to vector<32x128xf32>
      %50 = arith.mulf %48, %49 : vector<32x128xf32>
      %51 = vector.broadcast %47 : f32 to vector<32x128xf32>
      %52 = arith.mulf %51, %50 : vector<32x128xf32>
      %c0_35 = arith.constant 0 : index
      %c0_36 = arith.constant 0 : index
      %c0_37 = arith.constant 0 : index
      %53 = vector.load %arg6[%c0_35, %c0_36, %c0_37] : memref<1x32x128xf32, #tpu.memory_space<vmem>>, vector<1x32x128xf32>
      %54 = vector.shape_cast %53 : vector<1x32x128xf32> to vector<32x128xf32>
      %55 = arith.addf %52, %54 : vector<32x128xf32>
      %c0_38 = arith.constant 0 : index
      %c0_39 = arith.constant 0 : index
      %c0_40 = arith.constant 0 : index
      %56 = vector.load %arg8[%c0_38, %c0_39, %c0_40] : memref<1x32x128xf32, #tpu.memory_space<vmem>>, vector<1x32x128xf32>
      %57 = vector.shape_cast %56 : vector<1x32x128xf32> to vector<32x128xf32>
      %58 = vector.shape_cast %55 : vector<32x128xf32> to vector<1x32x128xf32>
      tpu.vector_store %arg8[%c0_38, %c0_39, %c0_40], %58 {strides = array<i32>} : memref<1x32x128xf32, #tpu.memory_space<vmem>>, vector<1x32x128xf32>,
    } else {
    }
    return
  }
  func.func @transform_0(%arg0: i32, %arg1: i32, %arg2: i32) -> (i32, i32, i32) {
    %c0_i32 = arith.constant 0 : i32
    %c0_i32_0 = arith.constant 0 : i32
    return %arg0, %c0_i32, %arg1 : i32, i32, i32
  }
  func.func @transform_1(%arg0: i32, %arg1: i32, %arg2: i32) -> (i32, i32, i32, i32) {
    %c0_i32 = arith.constant 0 : i32
    %c0_i32_0 = arith.constant 0 : i32
    %c0_i32_1 = arith.constant 0 : i32
    return %arg0, %arg2, %c0_i32, %c0_i32_0 : i32, i32, i32, i32
  }
  func.func @transform_2(%arg0: i32, %arg1: i32, %arg2: i32) -> (i32, i32, i32, i32) {
    %c0_i32 = arith.constant 0 : i32
    %c0_i32_0 = arith.constant 0 : i32
    %c0_i32_1 = arith.constant 0 : i32
    return %arg0, %arg2, %c0_i32, %c0_i32_0 : i32, i32, i32, i32
  }
  func.func @transform_3(%arg0: i32, %arg1: i32, %arg2: i32) -> (i32, i32, i32) {
    %c0_i32 = arith.constant 0 : i32
    %c0_i32_0 = arith.constant 0 : i32
    return %arg0, %c0_i32, %arg1 : i32, i32, i32
  }
  func.func @transform_4(%arg0: i32, %arg1: i32, %arg2: i32) -> i32 {
    %c0_i32 = arith.constant 0 : i32
    %c0_i32_0 = arith.constant 0 : i32
    return %c0_i32 : i32
  }
  func.func @transform_5(%arg0: i32, %arg1: i32, %arg2: i32) -> (i32, i32, i32) {
    %c0_i32 = arith.constant 0 : i32
    %c0_i32_0 = arith.constant 0 : i32
    return %arg0, %c0_i32, %arg1 : i32, i32, i32
  }
}

</mosaic_0001>

<bundles_post_ra>
// kernel: tpu_custom_call.1
= control target key start
LH: loop header
LB: loop body
LE: loop exit
PB: predicated region body
PF: predicated region fallthrough
CT: control target
= control target key end

     0   :  { %s1883_s0 = inlined_call_operand.hbm [shape: bf16[2,16,128], index: 0, kind: input, shape index: {}]   ;;  %s1884_s1 = inlined_call_operand.hbm [shape: bf16[2,1,16,128], index: 1, kind: input, shape index: {}]   ;;  %s1885_s2 = inlined_call_operand.hbm [shape: bf16[2,1,32,128], index: 2, kind: input, shape index: {}]   ;;  %s1886_s3 = inlined_call_operand.hbm [shape: f32[2,32,128], index: 3, kind: input, shape index: {}]   ;;  %s1887_s4 = inlined_call_operand.<no memory space> [shape: f32[1], index: 4, kind: input, shape index: {}]   ;;  %s1888_s5 = inlined_call_operand.hbm [shape: f32[2,32,128], index: 5, kind: output, shape index: {}]  }
   0x1   :  { %1897 = sst [smem:[#allocation21_spill]] %s1883_s0 }
   0x2   :  { %1898 = sst [smem:[#allocation22_spill]] %s1884_s1 }
   0x3   :  { %10 = sst [smem:[#allocation5]] %s1887_s4 }
   0x4   :  { %11 = vsyncpa [#allocation7], 0 }
   0x5   :  { %13 = vsyncpa [#allocation7 + $0x1], 0 }
   0x6   :  { %14 = vsyncpa [#allocation10], 0 }
   0x7   :  { %16 = vsyncpa [#allocation10 + $0x1], 0 }
   0x8   :  { %17 = vsyncpa [#allocation13], 0 }
   0x9   :  { %19 = vsyncpa [#allocation13 + $0x1], 0 }
   0xa   :  { %20 = vsyncpa [#allocation8], 0 }
   0xb   :  { %22 = vsyncpa [#allocation8 + $0x1], 0  ;;  %s1528_s20 = smov 0   ;;  %s1530_s21 = smov 0  }
   0xc   :  { %s1532_s22 = smov 0   ;;  %s1534_s23 = smov 0  }
   0xd   :  { %s1536_s24 = smov 0   ;;  %s1538_s25 = smov 0  }
   0xe LB: > { %s1559_s4 = sadd.s32 4294967295, %s1480_s25   ;;  %s1058_s26 = sadd.s32 4294967294, %s1480_s25   ;;  %s1480_s25 = sphi %s1538_s25, %s28_s25   ;;  %s1476_s24 = sphi %s1536_s24, %s1926_s24   ;;  %s1472_s23 = sphi %s1534_s23, %s1925_s23   ;;  %s1468_s22 = sphi %s1532_s22, %s1924_s22   ;;  %s1464_s21 = sphi %s1530_s21, %s1923_s21   ;;  %s1460_s20 = sphi %s1528_s20, %s1922_s20  }
   0xf   : > { %s47_s27 = sadd.s32 1, %s1476_s24  ;;  %s56_s28 = sadd.s32 1, %s1468_s22 }
  0x10   : > { %p49_p0 = scmp.ge.s32.totalorder %s47_s27, 2  ;;  %p63_p1 = scmp.ne.s32.totalorder %s1468_s22, %s1464_s21 }
  0x11   : > { %p64_p2 = scmp.eq.s32.totalorder %s1480_s25, 0  ;;  %p69_p3 = scmp.ne.s32.totalorder %s1464_s21, %s1460_s20 }
  0x12   : > { %s1928_s27 = smov (%p49_p0, %s47_s27), 0  ;;  %p70_p5 = scmp.eq.s32.totalorder %s1559_s4, 0 }
  0x13   : > { %1899 = sst [smem:[#allocation19_spill]] %s1928_s27  ;;  %p1571_p4 = por %p64_p2, %p63_p1 }
  0x14   : > { %s51_s30 = ssub.s32 %s1476_s24, %s1928_s27  ;;  %p200_p6 = scmp.eq.s32.totalorder %s1559_s4, 1 }
  0x15   : > { %p54_p7 = scmp.eq.s32.totalorder %s51_s30, 0  ;;  %p1579_p8 = por %p70_p5, %p69_p3 }
  0x16   : > { %p1583_p9 = por %p200_p6, %p63_p1  ;;  %p206_p10 = scmp.eq.s32.totalorder %s1058_s26, 1 }
  0x17   : > { %s1901_s6 = scalar_select %p1579_p8, 1, 0 }
  0x18   : > { %s1902_s7 = scalar_select %p1583_p9, 1, 0 }
  0x19   : > { %s1588_s8 = scalar_select %p54_p7, %s1468_s22, %s56_s28  }
  0x1a   : > { %p1590_p11 = por %p206_p10, %p69_p3  ;;  %p1185_p13 = scmp.lt.s32.totalorder %s1480_s25, 2 }
  0x1b   : > { %1903 = sst [smem:[#allocation20_spill]] %s1588_s8  ;;  %s1597_s10 = sand.u32 1, %s1468_s22  }
  0x1c   : > { %s1904_s9 = scalar_select %p1590_p11, 1, 0 }
  0x1d   : > { %s1889_s11 = sshll.u32 %s1597_s10, 3  ;;  %s1096_s12 = sshll.u32 %s1476_s24, 7 }
  0x1e   : > { %p1603_p0 = pnand %p1185_p13, %p1571_p4  ;;  %s251_s14 = sand.u32 1, %s1480_s25  }
  0x1f   : > { %s1906_s1 = sld [smem:[#allocation22_spill]]  ;;  %s255_s18 = scalar_lea.vmem [#allocation9], %s1889_s11 }
  0x20   : > { %s264_s19 = sshll.u32 %s255_s18, 4  ;;  %s1621_s26 = scalar_lea.sflag [#allocation10], %s251_s14  ;;  %s1618_s19 = int_to_ptr.vmem [resolvable:$true] %s264_s19 }
  0x21   : > { %p1627_p4 = pneg %p1603_p0 }
  0x25   : > { %s1613_s17 = scalar_lea.hbm %s1906_s1, %s1096_s12  ;;  %s1275_s16 = scalar_lea.hbm %s1906_s1, 256 }
  0x26   : > { %s1270_s28 = scalar_lea.hbm %s1613_s17, 128  ;;  %p1276_p7 = scmp.lt.u32.totalorder %s1613_s17, %s1906_s1 }
  0x27   : > { %p1271_p3 = scmp.ne.s32.totalorder %s1613_s17, %s1270_s28  ;;  %p1277_p10 = scmp.lt.u32.totalorder %s1275_s16, %s1270_s28 }
  0x28   : > { %p1279_p12 = scmp.lt.u32.totalorder %s1270_s28, %s1613_s17 }
  0x29   : > { %p1273_p5 = pnand %p1627_p4, %p1271_p3  ;;  %p1278_p13 = por %p1277_p10, %p1276_p7 }
  0x2b   : > { %p1274_p6 = pneg %p1273_p5  ;;  %p1280_p1 = por %p1279_p12, %p1278_p13 }
  0x2d   : > { %p1281_p2 = pnand %p1280_p1, %p1274_p6 }
  0x2f   : > { %1284 = shalt.err (!%p1281_p2)
}
  0x30   : > { %s1285_s14 = scalar_lea.vmem %s1618_s19, 128  ;;  %s1482_s30 = smov [#allocation9]  }
  0x31   : > { %p1286_p3 = scmp.ne.s32.totalorder %s1618_s19, %s1285_s14  ;;  %s1290_s15 = sshll.u32 %s1482_s30, 4  ;;  %s1291_s15 = int_to_ptr.vmem [resolvable:$false] %s1290_s15 }
  0x32   : > { %s1292_s11 = scalar_lea.vmem %s1291_s15, 256  ;;  %p1293_p9 = scmp.lt.s32.totalorder %s1618_s19, %s1291_s15 }
  0x33   : > { %p1288_p5 = pnand %p1286_p3, %p1627_p4  ;;  %p1294_p8 = scmp.lt.s32.totalorder %s1292_s11, %s1285_s14 }
  0x35   : > { %p1289_p11 = pneg %p1288_p5  ;;  %p1295_p7 = por %p1294_p8, %p1293_p9 }
  0x37   : > { %p1296_p10 = pnand %p1295_p7, %p1289_p11 }
  0x39   : > { %1299 = shalt.err (!%p1296_p10)
}
  0x3a   : > { %s1893_s28 = smov 64   ;;  %s1895_s16 = smov 4  }
  0x3b   : > { %1174 = dma.hbm_to_vmem [thread:$0]  (!%p1603_p0), %s1613_s17, 128, %s1618_s19, %s1621_s26, %s1893_s28, %s1893_s28, %s1895_s16  }
  0x3c   : > { %p1908_p8 = scmp.lt.s32.totalorder %s1480_s25, 3  ;;  %p1909_p9 = scmp.ge.s32.totalorder %s1480_s25, 1 }
  0x3d   : > { %s1911_s0 = sld [smem:[#allocation21_spill]]  ;;  %s1912_s11 = sshll.u32 %s1597_s10, 3 }
  0x3e   : > { %p1658_p11 = pnand %p1909_p9, %p1908_p8  ;;  %s233_s1 = scalar_lea.vmem [#allocation6], %s1912_s11 }
  0x3f   : > { %s241_s27 = sshll.u32 %s233_s1, 4  ;;  %s1067_s17 = sshll.u32 %s1597_s10, 4  ;;  %s1672_s27 = int_to_ptr.vmem [resolvable:$true] %s241_s27 }
  0x40   : > { %s1910_s18 = scalar_select %p1658_p11, 1, 0 }
  0x41   : > { %s230_s19 = scalar_lea.sflag [#allocation7], %s1597_s10 }
  0x43   : > { %s1667_s15 = scalar_lea.hbm %s1911_s0, %s1096_s12  ;;  %s1305_s12 = scalar_lea.hbm %s1911_s0, 256 }
  0x44   : > { %s1300_s28 = scalar_lea.hbm %s1667_s15, 128  ;;  %p1306_p6 = scmp.lt.u32.totalorder %s1667_s15, %s1911_s0 }
  0x45   : > { %p1301_p12 = scmp.ne.s32.totalorder %s1667_s15, %s1300_s28  ;;  %p1307_p13 = scmp.lt.u32.totalorder %s1305_s12, %s1300_s28 }
  0x46   : > { %p1309_p5 = scmp.lt.u32.totalorder %s1300_s28, %s1667_s15 }
  0x47   : > { %p1303_p1 = pnand %p1301_p12, %p1627_p4  ;;  %p1308_p3 = por %p1307_p13, %p1306_p6 }
  0x49   : > { %p1304_p2 = pneg %p1303_p1  ;;  %p1310_p7 = por %p1309_p5, %p1308_p3 }
  0x4b   : > { %p1311_p10 = pnand %p1310_p7, %p1304_p2 }
  0x4d   : > { %1314 = shalt.err (!%p1311_p10)
}
  0x4e   : > { %s1315_s1 = scalar_lea.vmem %s1672_s27, 128  ;;  %s1485_s16 = smov [#allocation6]  }
  0x4f   : > { %p1316_p8 = scmp.ne.s32.totalorder %s1672_s27, %s1315_s1  ;;  %s1320_s11 = sshll.u32 %s1485_s16, 4  ;;  %s1321_s11 = int_to_ptr.vmem [resolvable:$false] %s1320_s11 }
  0x50   : > { %s1322_s8 = scalar_lea.vmem %s1321_s11, 256  ;;  %p1323_p1 = scmp.lt.s32.totalorder %s1672_s27, %s1321_s11 }
  0x51   : > { %p1318_p9 = pnand %p1316_p8, %p1627_p4  ;;  %p1324_p11 = scmp.lt.s32.totalorder %s1322_s8, %s1315_s1 }
  0x53   : > { %p1319_p12 = pneg %p1318_p9  ;;  %p1325_p6 = por %p1324_p11, %p1323_p1 }
  0x55   : > { %p1326_p13 = pnand %p1325_p6, %p1319_p12 }
  0x57   : > { %1329 = shalt.err (!%p1326_p13)
}
  0x58   : > { %s1913_s28 = smov 4   ;;  %s1914_s14 = smov 64  }
  0x59   : > { %1171 = dma.hbm_to_vmem [thread:$0]  (!%p1603_p0), %s1667_s15, 128, %s1672_s27, %s230_s19, %s1914_s14, %s1914_s14, %s1913_s28  }
  0x5a   : > { %s1098_s12 = sshll.u32 %s1476_s24, 8  ;;  %s278_s30 = scalar_lea.vmem [#allocation11], %s1067_s17 }
  0x5b   : > { %s287_s1 = sshll.u32 %s278_s30, 4  ;;  %s1707_s8 = scalar_lea.hbm %s1885_s2, %s1098_s12  ;;  %s1709_s1 = int_to_ptr.vmem [resolvable:$true] %s287_s1 }
  0x5c   : > { %s1330_s0 = scalar_lea.hbm %s1707_s8, 256  ;;  %s1335_s17 = scalar_lea.hbm %s1885_s2, 512 }
  0x5d   : > { %p1331_p11 = scmp.ne.s32.totalorder %s1707_s8, %s1330_s0  ;;  %p1336_p5 = scmp.lt.u32.totalorder %s1707_s8, %s1885_s2 }
  0x5e   : > { %p1337_p7 = scmp.lt.u32.totalorder %s1335_s17, %s1330_s0  ;;  %p1339_p8 = scmp.lt.u32.totalorder %s1330_s0, %s1707_s8 }
  0x5f   : > { %p1333_p2 = pnand %p1331_p11, %p1627_p4 }
  0x60   : > { %p1338_p10 = por %p1337_p7, %p1336_p5 }
  0x61   : > { %p1334_p3 = pneg %p1333_p2 }
  0x62   : > { %p1340_p9 = por %p1339_p8, %p1338_p10 }
  0x64   : > { %p1341_p12 = pnand %p1340_p9, %p1334_p3 }
  0x66   : > { %1344 = shalt.err (!%p1341_p12)
}
  0x67   : > { %s1345_s12 = scalar_lea.vmem %s1709_s1, 256  ;;  %s1486_s16 = smov [#allocation11]  }
  0x68   : > { %p1346_p1 = scmp.ne.s32.totalorder %s1709_s1, %s1345_s12  ;;  %s1350_s11 = sshll.u32 %s1486_s16, 4  ;;  %s1351_s11 = int_to_ptr.vmem [resolvable:$false] %s1350_s11 }
  0x69   : > { %s1352_s27 = scalar_lea.vmem %s1351_s11, 512  ;;  %p1353_p11 = scmp.lt.s32.totalorder %s1709_s1, %s1351_s11 }
  0x6a   : > { %p1348_p6 = pnand %p1346_p1, %p1627_p4  ;;  %p1354_p2 = scmp.lt.s32.totalorder %s1352_s27, %s1345_s12 }
  0x6c   : > { %p1349_p13 = pneg %p1348_p6  ;;  %p1355_p5 = por %p1354_p2, %p1353_p11 }
  0x6e   : > { %p1356_p7 = pnand %p1355_p5, %p1349_p13 }
  0x70   : > { %1359 = shalt.err (!%p1356_p7)
}
  0x71   : > { %1177 = dma.hbm_to_vmem [thread:$0]  (!%p1603_p0), %s1707_s8, 256, %s1709_s1, %s1621_s26, %s1914_s14, %s1914_s14, %s1913_s28  }
  0x72   : > { %s1070_s0 = sshll.u32 %s1597_s10, 5  ;;  %s1099_s15 = sshll.u32 %s1476_s24, 9 }
  0x73   : > { %s1741_s30 = scalar_lea.hbm %s1886_s3, %s1099_s15  ;;  %s301_s12 = scalar_lea.vmem [#allocation12], %s1070_s0 }
  0x74   : > { %s309_s16 = sshll.u32 %s301_s12, 4  ;;  %s298_s11 = scalar_lea.sflag [#allocation13], %s1597_s10  ;;  %s1743_s16 = int_to_ptr.vmem [resolvable:$true] %s309_s16 }
  0x75   : > { %s1360_s27 = scalar_lea.hbm %s1741_s30, 512  ;;  %s1365_s14 = scalar_lea.hbm %s1886_s3, 1024 }
  0x76   : > { %p1361_p3 = scmp.ne.s32.totalorder %s1741_s30, %s1360_s27  ;;  %p1366_p9 = scmp.lt.u32.totalorder %s1741_s30, %s1886_s3 }
  0x77   : > { %p1367_p12 = scmp.lt.u32.totalorder %s1365_s14, %s1360_s27  ;;  %p1369_p6 = scmp.lt.u32.totalorder %s1360_s27, %s1741_s30 }
  0x78   : > { %p1363_p10 = pnand %p1361_p3, %p1627_p4 }
  0x79   : > { %p1368_p1 = por %p1367_p12, %p1366_p9 }
  0x7a   : > { %p1364_p8 = pneg %p1363_p10 }
  0x7b   : > { %p1370_p13 = por %p1369_p6, %p1368_p1 }
  0x7d   : > { %p1371_p11 = pnand %p1370_p13, %p1364_p8 }
  0x7f   : > { %1374 = shalt.err (!%p1371_p11)
}
  0x80   : > { %s1375_s0 = scalar_lea.vmem %s1743_s16, 512  ;;  %s1487_s15 = smov [#allocation12]  }
  0x81   : > { %p1376_p2 = scmp.ne.s32.totalorder %s1743_s16, %s1375_s0  ;;  %s1380_s17 = sshll.u32 %s1487_s15, 4  ;;  %s1381_s17 = int_to_ptr.vmem [resolvable:$false] %s1380_s17 }
  0x82   : > { %s1382_s19 = scalar_lea.vmem %s1381_s17, 1024  ;;  %p1383_p3 = scmp.lt.s32.totalorder %s1743_s16, %s1381_s17 }
  0x83   : > { %p1378_p5 = pnand %p1376_p2, %p1627_p4  ;;  %p1384_p10 = scmp.lt.s32.totalorder %s1382_s19, %s1375_s0 }
  0x85   : > { %p1379_p7 = pneg %p1378_p5  ;;  %p1385_p9 = por %p1384_p10, %p1383_p3 }
  0x87   : > { %p1386_p12 = pnand %p1385_p9, %p1379_p7 }
  0x89   : > { %1389 = shalt.err (!%p1386_p12)
}
  0x8a   : > { %s1488_s12 = smov 128   ;;  %s1489_s27 = smov 8  }
  0x8b   : > { %1180 = dma.hbm_to_vmem [thread:$0]  (!%p1603_p0), %s1741_s30, 512, %s1743_s16, %s298_s11, %s1488_s12, %s1488_s12, %s1489_s27  }
  0x8c   : > { %p1915_p4 = scmp.ne.s32.totalorder %s1910_s18, 0 }
  0x8d   : > { %s1772_s29 = sand.u32 (!%p1915_p4), 1, %s1464_s21   ;;  %p1916_p8 = scmp.ne.s32.totalorder (!%p1915_p4), %s1901_s6, 0 }
  0x8e   : > { %321 = sbr.rel (%p1915_p4) target bundleno = 799 (0x31f), region = 40  ;;  %s1074_s26 = sshll.u32 (!%p1915_p4), %s1772_s29, 3 }
  0x8f   : > { %s324_s28 = scalar_lea.sflag (!%p1915_p4), [#allocation7], %s1772_s29  ;;  %s327_s14 = scalar_lea.vmem (!%p1915_p4), [#allocation6], %s1074_s26 }
  0x95   : > { %1443 = dma.done.wait (%p1916_p8), %s324_s28, 128  }
  0x96   : > { %1445 = vsyncadd (%p1916_p8), %s324_s28, 4294967168  ;;  %s332_s10 = sand.u32 1, %s1559_s4   ;;  %s336_s18 = scalar_lea.vmem [#allocation9], %s1074_s26 }
  0x97   : > { %s333_s13 = scalar_lea.sflag [#allocation10], %s332_s10 }
  0x98   : > { %1447 = dma.done.wait (%p1916_p8), %s333_s13, 384  }
  0x99   : > { %1449 = vsyncadd (%p1916_p8), %s333_s13, 4294966912  ;;  %s1076_s30 = sshll.u32 %s1772_s29, 4  ;;  %s1077_s16 = sshll.u32 %s1772_s29, 5 }
  0x9a   : > { %s1787_s11 = scalar_lea.vmem [#allocation11], %s1076_s30  ;;  %s351_s1 = scalar_lea.sflag [#allocation13], %s1772_s29 }
  0x9b   : > { %s1792_s8 = scalar_lea.vmem [#allocation12], %s1077_s16 }
  0x9c   : > { %1451 = dma.done.wait (%p1916_p8), %s351_s1, 512  }
  0x9d   : > { %1453 = vsyncadd (%p1916_p8), %s351_s1, 4294966784  ;;  %v1244_v0 = vld [vmem:[%s336_s18] sm:$0xff]   ;;  %v1245_v1 = vld [vmem:[%s327_s14] sm:$0xff]   ;;  %vm439_vm0 = vcmask 130048   ;;  %v1490_v6 = vmov -1e+30   ;;  %v670_v30 = vlaneseq }
  0x9e   : > { %417 = vxpose.xlu0.c.b16.start.end [1/1] (short) %v1244_v0, 128  ;;  %1120 = vmatprep.subr.bf16.mxu0 %v1245_v1  ;;  %401 = vst [vmem:[#allocation3] sm:$0x1] %v1490_v6  ;;  %v1491_v7 = vmov 0.0   ;;  %v1246_v9 = vld [vmem:[%s1787_s11] sm:$0xff]   ;;  %s848_s4 = sld [smem:[#allocation5]]  ;;  %s395_s6 = scalar_lea.vmem [#allocation14], %s1077_s16 }
  0x9f   : > { %1121 = vmatpush3.bf16.msra.mxu0 %v1245_v1  ;;  %402 = vst [vmem:[#allocation4] sm:$0x1] %v1491_v7  ;;  %1154 = vmatprep.mubr.bf16.mxu1 %v1246_v9  ;;  %v671_v33 = vshrl.u32 %v670_v30, 7  ;;  %s895_s0 = sshll.u32 %s395_s6, 4  ;;  %s1100_s15 = sshll.u32 %s1472_s23, 9  ;;  %s1829_s0 = int_to_ptr.vmem [resolvable:$true] %s895_s0 }
  0xa0   : > { %s1834_s12 = scalar_lea.hbm %s1888_s5, %s1100_s15  ;;  %s881_s23 = scalar_lea.sflag [#allocation8], %s1772_s29 }
  0xa1   : > { %v1809_v37 = vsub.s32 0, %v671_v33  ;;  %s1390_s27 = scalar_lea.vmem %s1829_s0, 512  ;;  %p1917_p1 = scmp.ne.s32.totalorder %s1902_s7, 0 }
  0xa2   : > { %p1391_p0 = scmp.ne.s32.totalorder %s1829_s0, %s1390_s27  ;;  %s1492_s26 = smov [#allocation14]  }
  0xa3   : > { %s1394_s28 = sshll.u32 %s1492_s26, 4  ;;  %s1395_s28 = int_to_ptr.vmem [resolvable:$false] %s1394_s28 }
  0xa4   : > { %p1392_p6 = pnand %p1391_p0, %p1917_p1  ;;  %s1396_s14 = scalar_lea.vmem %s1395_s28, 1024 }
  0xa5   : > { %v1807_v35 = vld [vmem:[#allocation3] sm:$0x1]  ;;  %p1397_p11 = scmp.lt.s32.totalorder %s1829_s0, %s1395_s28  ;;  %p1398_p2 = scmp.lt.s32.totalorder %s1396_s14, %s1390_s27 }
  0xa6   : > { %p1393_p13 = pneg %p1392_p6 }
  0xa7   : > { %p1399_p5 = por %p1398_p2, %p1397_p11 }
  0xa9   : > { %p1400_p7 = pnand %p1399_p5, %p1393_p13 }
 0x104   : > { %v425_v2 = vpop.trf.xlu0 }
 0x105   : > { %1122 = vmatprep.mubr.msk.bf16.mxu0 %vm439_vm0, %v425_v2 }
 0x108   : > { %v426_v3 = vpop.trf.xlu0 }
 0x109   : > { %1123 = vmatmul.mubr.msk.bf16.vlgmr.msra.gmra.mrb[0].mxu0 %vm439_vm0, %v426_v3 }
 0x10c   : > { %v427_v4 = vpop.trf.xlu0 }
 0x10d   : > { %1126 = vmatprep.mubr.msk.bf16.mxu0 %vm439_vm0, %v427_v4 }
 0x110   : > { %v428_v5 = vpop.trf.xlu0 }
 0x111   : > { %1127 = vmatmul.mubr.msk.bf16.gmra.mrb[4].mxu0 %vm439_vm0, %v428_v5 }
 0x114   : > { %v429_v8 = vpop.trf.xlu0 }
 0x115   : > { %1130 = vmatprep.mubr.msk.bf16.mxu0 %vm439_vm0, %v429_v8 }
 0x118   : > { %v430_v10 = vpop.trf.xlu0 }
 0x119   : > { %1131 = vmatmul.mubr.msk.bf16.gmra.mrb[8].mxu0 %vm439_vm0, %v430_v10 }
 0x11c   : > { %v431_v11 = vpop.trf.xlu0 }
 0x11d   : > { %1134 = vmatprep.mubr.msk.bf16.mxu0 %vm439_vm0, %v431_v11 }
 0x120   : > { %v432_v12 = vpop.trf.xlu0 }
 0x121   : > { %1135 = vmatmul.mubr.msk.bf16.gmra.mrb[12].mxu0 %vm439_vm0, %v432_v12 }
 0x1dc   : > { %v1124_v13 = vpop.f32.mrb[0].mxu0 }
 0x1dd   : > { %v498_v14 = vpop.f32.mrb[1].mxu0 }
 0x1de   : > { %v1125_v15 = vpop.f32.mrb[2].mxu0 }
 0x1df   : > { %v501_v16 = vpop.f32.mrb[3].mxu0 }
 0x1e4   : > { %v1128_v17 = vpop.f32.mrb[4].mxu0 }
 0x1e5   : > { %v649_v18 = vmax.f32 %v1124_v13, %v1128_v17  ;;  %v514_v19 = vpop.f32.mrb[5].mxu0 }
 0x1e6   : > { %v647_v20 = vmax.f32 %v498_v14, %v514_v19  ;;  %v1129_v21 = vpop.f32.mrb[6].mxu0 }
 0x1e7   : > { %v650_v22 = vmax.f32 %v1125_v15, %v1129_v21  ;;  %v517_v23 = vpop.f32.mrb[7].mxu0 }
 0x1e8   : > { %v648_v24 = vmax.f32 %v501_v16, %v517_v23 }
 0x1e9   : > { %v660_v25 = vmax.f32 %v649_v18, %v650_v22 }
 0x1ea   : > { %v659_v26 = vmax.f32 %v647_v20, %v648_v24 }
 0x1ec   : > { %v661_v27 = vmax.f32 %v659_v26, %v660_v25  ;;  %v1247_v26 = vld [vmem:[%s1787_s11 + $0x8] sm:$0xff]  }
 0x1ee   : > { %v662_v28 = vrot.slane %v661_v27, 4 }
 0x1f0   : > { %v663_v29 = vmax.f32 %v661_v27, %v662_v28 }
 0x1f2   : > { %v664_v31 = vrot.slane %v663_v29, 2 }
 0x1f4   : > { %v665_v32 = vmax.f32 %v663_v29, %v664_v31  ;;  %v726_v31 = vld [vmem:[#allocation4] sm:$0x1] }
 0x1f6   : > { %v666_v34 = vrot.slane %v665_v32, 1 }
 0x1f8   : > { %v667_v36 = vmax.f32 %v665_v32, %v666_v34 }
 0x1fa   : > { %v1812_v38 = vmax.f32 %v1807_v35, %v667_v36  ;;  %v1132_v36 = vpop.f32.mrb[8].mxu0 }
 0x1fc   : > { %v673_v39 = vrot.slane %v1812_v38, %v1809_v37  ;;  %842 = vst [vmem:[#allocation3] sm:$0x1] %v1812_v38  ;;  %v723_v18 = vsub.f32 %v1807_v35, %v1812_v38  ;;  %v530_v38 = vpop.f32.mrb[9].mxu0 }
 0x1fe   : > { %v680_v40 = vsub.f32 %v517_v23, %v673_v39  ;;  %v675_v41 = vsub.f32 %v498_v14, %v673_v39  ;;  %v676_v42 = vsub.f32 %v501_v16, %v673_v39  ;;  %v677_v43 = vsub.f32 %v1124_v13, %v673_v39 }
 0x1ff   : > { %v678_v44 = vsub.f32 %v1125_v15, %v673_v39  ;;  %v679_v45 = vsub.f32 %v514_v19, %v673_v39  ;;  %v681_v49 = vsub.f32 %v1128_v17, %v673_v39  ;;  %v682_v51 = vsub.f32 %v1129_v21, %v673_v39 }
 0x200   : > { %v701_v46 = vmul.f32 1.442695, %v680_v40  ;;  %v691_v47 = vmul.f32 1.442695, %v675_v41  ;;  %v693_v48 = vmul.f32 1.442695, %v676_v42 }
 0x201   : > { %v695_v50 = vmul.f32 1.442695, %v677_v43  ;;  %v697_v52 = vmul.f32 1.442695, %v678_v44  ;;  %v699_v53 = vmul.f32 1.442695, %v679_v45 }
 0x202   : > { %1248 = vpow2.f32 %v701_v46  ;;  %v703_v54 = vmul.f32 1.442695, %v681_v49  ;;  %v705_v55 = vmul.f32 1.442695, %v682_v51  ;;  %v683_v56 = vsub.f32 -inf, %v673_v39  ;;  %v1133_v39 = vpop.f32.mrb[10].mxu0 }
 0x203   : > { %1250 = vpow2.f32 %v691_v47  ;;  %v724_v21 = vmul.f32 1.442695, %v723_v18  ;;  %v533_v40 = vpop.f32.mrb[11].mxu0 }
 0x204   : > { %1252 = vpow2.f32 %v693_v48  ;;  %v707_v58 = vmul.f32 1.442695, %v683_v56  ;;  %v1136_v41 = vpop.f32.mrb[12].mxu0 }
 0x205   : > { %1254 = vpow2.f32 %v695_v50  ;;  %v546_v42 = vpop.f32.mrb[13].mxu0 }
 0x206   : > { %1256 = vpow2.f32 %v697_v52  ;;  %v1137_v43 = vpop.f32.mrb[14].mxu0 }
 0x207   : > { %1258 = vpow2.f32 %v699_v53  ;;  %v549_v44 = vpop.f32.mrb[15].mxu0  ;;  %v863_v53 = vstv %s848_s4 }
 0x208   : > { %1260 = vpow2.f32 %v703_v54 }
 0x209   : > { %1262 = vpow2.f32 %v705_v55 }
 0x20a   : > { %1264 = vpow2.f32 %v707_v58 }
 0x20b   : > { %1266 = vpow2.f32 %v724_v21 }
 0x20c   : > { %v1249_v57 = vpop.eup %1248 }
 0x20d   : > { %v1251_v59 = vpop.eup %1250 }
 0x20e   : > { %v1253_v60 = vpop.eup %1252 }
 0x20f   : > { %v1255_v61 = vpop.eup %1254  ;;  %v728_v62 = vadd.f32 %v1253_v60, %v1251_v59  ;;  %v765_v63 = vpack.c.bf16 %v1253_v60, %v1251_v59  ;;  %v870_v59 = vld [vmem:[%s1792_s8 + $0x10] sm:$0xff] }
 0x210   : > { %v1257_v0 = vpop.eup %1256 }
 0x211   : > { %v1259_v1 = vpop.eup %1258  ;;  %v729_v2 = vadd.f32 %v1255_v61, %v728_v62  ;;  %1138 = vmatprep.subr.bf16.mxu1 %v765_v63  ;;  %v766_v3 = vpack.c.bf16 %v1257_v0, %v1255_v61 }
 0x212   : > { %v1261_v4 = vpop.eup %1260  ;;  %1139 = vmatpush3.bf16.msra.mxu1 %v765_v63  ;;  %v767_v5 = vpack.c.bf16 %v1249_v57, %v1259_v1  ;;  %v868_v63 = vld [vmem:[%s1792_s8] sm:$0xff] }
 0x213   : > { %v1263_v6 = vpop.eup %1262  ;;  %v730_v7 = vadd.f32 %v1257_v0, %v729_v2  ;;  %1140 = vmatprep.subr.bf16.mxu1 %v766_v3 }
 0x214   : > { %v768_v8 = vpack.c.bf16 %v1263_v6, %v1261_v4  ;;  %v1265_v12 = vpop.eup %1264 }
 0x215   : > { %v731_v9 = vadd.f32 %v1259_v1, %v730_v7  ;;  %v769_v15 = vpack.c.bf16 %v1265_v12, %v1265_v12  ;;  %v1267_v30 = vpop.eup %1266  ;;  %v871_v1 = vld [vmem:[%s1792_s8 + $0x18] sm:$0xff] }
 0x216   : > { %1141 = vmatpush3.bf16.msra.mxu1 %v766_v3  ;;  %v727_v33 = vmul.f32 %v1267_v30, %v726_v31  ;;  %v759_v46 = vrot.slane %v1267_v30, %v1809_v37 }
 0x217   : > { %v732_v10 = vadd.f32 %v1249_v57, %v731_v9  ;;  %1142 = vmatprep.subr.bf16.mxu1 %v767_v5 }
 0x218   : > { %v761_v48 = vmul.f32 0.0, %v759_v46 }
 0x219   : > { %v733_v11 = vadd.f32 %v1261_v4, %v732_v10 }
 0x21a   : > { %1143 = vmatpush3.bf16.msra.mxu1 %v767_v5  ;;  %v869_v5 = vld [vmem:[%s1792_s8 + $0x8] sm:$0xff] }
 0x21b   : > { %v734_v13 = vadd.f32 %v1263_v6, %v733_v11  ;;  %1144 = vmatprep.subr.bf16.mxu1 %v768_v8 }
 0x21d   : > { %v735_v14 = vadd.f32 %v1265_v12, %v734_v13 }
 0x21e   : > { %1145 = vmatpush3.bf16.msra.mxu1 %v768_v8 }
 0x21f   : > { %v736_v16 = vadd.f32 %v1265_v12, %v735_v14  ;;  %1146 = vmatprep.subr.bf16.mxu1 %v769_v15 }
 0x221   : > { %v737_v17 = vadd.f32 %v1265_v12, %v736_v16 }
 0x222   : > { %1147 = vmatpush3.bf16.msra.mxu1 %v769_v15 }
 0x223   : > { %v738_v19 = vadd.f32 %v1265_v12, %v737_v17  ;;  %1148 = vmatprep.subr.bf16.mxu1 %v769_v15 }
 0x225   : > { %v739_v20 = vadd.f32 %v1265_v12, %v738_v19 }
 0x226   : > { %1149 = vmatpush3.bf16.msra.mxu1 %v769_v15 }
 0x227   : > { %v740_v22 = vadd.f32 %v1265_v12, %v739_v20  ;;  %1150 = vmatprep.subr.bf16.mxu1 %v769_v15 }
 0x229   : > { %v741_v23 = vadd.f32 %v1265_v12, %v740_v22 }
 0x22a   : > { %1151 = vmatpush3.bf16.msra.mxu1 %v769_v15 }
 0x22b   : > { %v742_v24 = vadd.f32 %v1265_v12, %v741_v23  ;;  %1152 = vmatprep.subr.bf16.mxu1 %v769_v15 }
 0x22d   : > { %v743_v25 = vrot.slane %v742_v24, 4 }
 0x22e   : > { %1153 = vmatpush3.bf16.msra.mxu1 %v769_v15 }
 0x22f   : > { %v744_v27 = vadd.f32 %v743_v25, %v742_v24 }
 0x231   : > { %v745_v28 = vrot.slane %v744_v27, 2  ;;  %1155 = vmatmul.mubr.bf16.vlgmr.msra.gmra.mrb[0].mxu1 %v1247_v26 }
 0x233   : > { %v746_v29 = vadd.f32 %v745_v28, %v744_v27 }
 0x235   : > { %v747_v32 = vrot.slane %v746_v29, 1 }
 0x237   : > { %v748_v34 = vadd.f32 %v747_v32, %v746_v29 }
 0x239   : > { %v749_v35 = vadd.f32 %v748_v34, %v727_v33 }
 0x23b   : > { %750 = vst [vmem:[#allocation4] sm:$0x1] %v749_v35 }
 0x242   : > { %v846_v45 = vld [vmem:[#allocation4] sm:$0x1] }
 0x243   : > { %1268 = vrcp.f32 %v846_v45 }
 0x24d   : > { %v1269_v47 = vpop.eup %1268 }
 0x24e   : > { %v857_v51 = vrot.slane %v1269_v47, %v1809_v37 }
 0x304   : > { %v1156_v49 = vpop.f32.mrb[0].mxu1 }
 0x305   : > { %v836_v50 = vadd.f32 %v1156_v49, %v761_v48  ;;  %v819_v52 = vpop.f32.mrb[1].mxu1 }
 0x306   : > { %v834_v54 = vadd.f32 %v819_v52, %v761_v48  ;;  %v1157_v55 = vpop.f32.mrb[2].mxu1 }
 0x307   : > { %v861_v56 = vmul.f32 %v857_v51, %v836_v50  ;;  %v837_v57 = vadd.f32 %v1157_v55, %v761_v48  ;;  %v822_v58 = vpop.f32.mrb[3].mxu1 }
 0x308   : > { %v859_v60 = vmul.f32 %v857_v51, %v834_v54  ;;  %v835_v61 = vadd.f32 %v822_v58, %v761_v48 }
 0x309   : > { %v866_v62 = vmul.f32 %v863_v53, %v861_v56  ;;  %v862_v0 = vmul.f32 %v857_v51, %v837_v57 }
 0x30a   : > { %v864_v37 = vmul.f32 %v863_v53, %v859_v60  ;;  %v860_v2 = vmul.f32 %v857_v51, %v835_v61 }
 0x30b   : > { %v874_v3 = vadd.f32 %v870_v59, %v866_v62  ;;  %v867_v4 = vmul.f32 %v863_v53, %v862_v0 }
 0x30c   : > { %v872_v6 = vadd.f32 %v868_v63, %v864_v37  ;;  %v865_v7 = vmul.f32 %v863_v53, %v860_v2 }
 0x30d   : > { %878 = vst [vmem:[%s395_s6 + $0x10] sm:$0xff] %v874_v3  ;;  %v875_v8 = vadd.f32 %v871_v1, %v867_v4 }
 0x30e   : > { %876 = vst [vmem:[%s395_s6] sm:$0xff] %v872_v6  ;;  %v873_v9 = vadd.f32 %v869_v5, %v865_v7 }
 0x30f   : > { %879 = vst [vmem:[%s395_s6 + $0x18] sm:$0xff] %v875_v8 }
 0x310   : > { %877 = vst [vmem:[%s395_s6 + $0x8] sm:$0xff] %v873_v9 }
 0x311   : > { %1403 = shalt.err (!%p1400_p7)
}
 0x312   : > { %s1404_s10 = scalar_lea.hbm %s1834_s12, 512  ;;  %s1408_s30 = scalar_lea.hbm %s1888_s5, 1024 }
 0x313   : > { %p1405_p3 = scmp.ne.s32.totalorder %s1834_s12, %s1404_s10  ;;  %p1409_p12 = scmp.lt.u32.totalorder %s1834_s12, %s1888_s5 }
 0x314   : > { %p1410_p4 = scmp.lt.u32.totalorder %s1408_s30, %s1404_s10  ;;  %p1412_p0 = scmp.lt.u32.totalorder %s1404_s10, %s1834_s12 }
 0x315   : > { %p1406_p10 = pnand %p1405_p3, %p1917_p1 }
 0x316   : > { %p1411_p8 = por %p1410_p4, %p1409_p12 }
 0x317   : > { %p1407_p9 = pneg %p1406_p10 }
 0x318   : > { %p1413_p6 = por %p1412_p0, %p1411_p8 }
 0x31a   : > { %p1414_p13 = pnand %p1413_p6, %p1407_p9 }
 0x31c   : > { %1417 = shalt.err (!%p1414_p13)
}
 0x31d   : > { %s1493_s1 = smov 128   ;;  %s1494_s8 = smov 8  }
 0x31e   : > { %1166 = dma.vmem_to_hbm [thread:$0]  (%p1917_p1), %s1829_s0, 512, %s1834_s12, %s881_s23, %s1493_s1, %s1493_s1, %s1494_s8  }
 0x31f PF: > { %s910_s4 = sand.u32 1, %s1460_s20   ;;  %p1918_p11 = scmp.ne.s32.totalorder %s1904_s9, 0 }
 0x320   : > { %p1919_p2 = scmp.ge.s32.totalorder %s1480_s25, 2  ;;  %s911_s6 = scalar_lea.sflag [#allocation8], %s910_s4 }
 0x322   : > { %p1182_p5 = pnand %p1919_p2, %p1918_p11 }
 0x324   : > { %1455 = dma.done.wait (!%p1182_p5), %s911_s6, 512  }
 0x325   : > { %1457 = vsyncadd (!%p1182_p5), %s911_s6, 4294966784  ;;  %s28_s25 = sadd.s32 1, %s1480_s25   ;;  %s1920_s15 = sld [smem:[#allocation20_spill]] }
 0x326   : > { %p25_p7 = scmp.ge.s32.totalorder %s28_s25, 4   ;;  %s1921_s7 = sld [smem:[#allocation19_spill]] }
 0x327   : > { %s1922_s20 = smov %s1464_s21  ;;  %s1923_s21 = smov %s1468_s22 }
 0x328   : > { %s1925_s23 = smov %s1476_s24  ;;  %27 = sbr.rel (!%p25_p7) target bundleno = 14 (0xe), region = 130 }
 0x32b   : > { %s1924_s22 = smov %s1920_s15 }
 0x32c   : > { %s1926_s24 = smov %s1921_s7 }
 0x32f   :  { %916 = vsyncpa [#allocation7], 1 }
 0x330   :  { %918 = vsyncpa [#allocation7 + $0x1], 1 }
 0x331   :  { %919 = vsyncpa [#allocation10], 1 }
 0x332   :  { %921 = vsyncpa [#allocation10 + $0x1], 1 }
 0x333   :  { %922 = vsyncpa [#allocation13], 1 }
 0x334   :  { %924 = vsyncpa [#allocation13 + $0x1], 1 }
 0x335   :  { %925 = vsyncpa [#allocation8], 1 }
 0x336   :  { %927 = vsyncpa [#allocation8 + $0x1], 1 }

</bundles_post_ra>
